<compile_context>
chip_gen: v5e
topology: v5e:2x2
jax: 0.10.0
libtpu: 0.0.40
codegen_flags: <defaults>
</compile_context>

<pallas_src>
import functools

import jax
import jax.numpy as jnp
from jax.experimental import pallas as pl
from jax.experimental.pallas import tpu as pltpu

LANES = 128          # lane tile (last dim)
DESIRED_ROWS = 4096  # 4096 x 128 x 4B = 2 MiB per input block
NCORES = 2           # leading "parallel" grid axis (v7x dual TensorCore)


def _charbonnier_kernel(x_ref, y_ref, out_ref, acc_ref, *,
                        eps, n, tile_rows, tiles_per_core):
    c = pl.program_id(0)
    j = pl.program_id(1)

    @pl.when(j == 0)
    def _init():
        acc_ref[...] = jnp.zeros_like(acc_ref)

    x = x_ref[...].astype(jnp.float32)
    y = y_ref[...].astype(jnp.float32)
    diff = x - y
    err = jnp.sqrt(diff * diff + eps)

    # Mask everything past the n valid elements: ragged last row, rows past
    # the end of the array (partial last block), and fully-clamped duplicate
    # tiles on the last core. Masked lanes contribute exactly 0.
    t = c * tiles_per_core + j                      # global tile index (unclamped)
    row_ids = jax.lax.broadcasted_iota(jnp.int32, (tile_rows, LANES), 0)
    col_ids = jax.lax.broadcasted_iota(jnp.int32, (tile_rows, LANES), 1)
    grow = t * tile_rows + row_ids                  # global row index
    rows_full = n // LANES
    rem = n % LANES
    valid = (grow < rows_full) | ((grow == rows_full) & (col_ids < rem))
    err = jnp.where(valid, err, 0.0)

    # Per-lane partial sums (sublane reduce only; no cross-lane work here).
    acc_ref[...] += jnp.sum(err, axis=0, keepdims=True)

    @pl.when(j == pl.num_programs(1) - 1)
    def _finalize():
        out_ref[...] = acc_ref[...].reshape(1, 1, LANES)


def l1_charbonnier_loss(x, y, eps=1e-6):
    """Charbonnier (smooth L1) loss, computed in a Pallas TPU kernel."""
    assert x.shape == y.shape, "X and Y must have the same shape"
    n = int(x.size)

    xf = x.reshape(-1)
    yf = y.reshape(-1)

    # Tiny pad (< 128 elems) only so the lane-dense reshape is legal; the
    # padded elements are masked inside the kernel, so no correction needed.
    pad = (-n) % LANES
    if pad:
        xf = jnp.pad(xf, (0, pad))
        yf = jnp.pad(yf, (0, pad))
    rows = (n + pad) // LANES
    x2 = xf.reshape(rows, LANES)
    y2 = yf.reshape(rows, LANES)

    # Biggest block that fits the budget; full-array block for small inputs
    # (a full-extent dim is always a legal block dim).
    tile_rows = rows if rows <= DESIRED_ROWS else DESIRED_ROWS
    tiles_total = pl.cdiv(rows, tile_rows)
    tiles_per_core = pl.cdiv(tiles_total, NCORES)

    kernel = functools.partial(
        _charbonnier_kernel,
        eps=float(eps),
        n=n,
        tile_rows=int(tile_rows),
        tiles_per_core=int(tiles_per_core),
    )

    def in_map(c, j):
        # Clamp so the last core never requests an out-of-range block; the
        # kernel masks the duplicated tile to zero anyway.
        return (jnp.minimum(c * tiles_per_core + j, tiles_total - 1), 0)

    partials = pl.pallas_call(
        kernel,
        out_shape=jax.ShapeDtypeStruct((NCORES, 1, LANES), jnp.float32),
        grid_spec=pltpu.PrefetchScalarGridSpec(
            num_scalar_prefetch=0,
            grid=(NCORES, tiles_per_core),
            in_specs=[
                pl.BlockSpec((tile_rows, LANES), in_map),
                pl.BlockSpec((tile_rows, LANES), in_map),
            ],
            out_specs=pl.BlockSpec((1, 1, LANES), lambda c, j: (c, 0, 0)),
            scratch_shapes=[pltpu.VMEM((1, LANES), jnp.float32)],
        ),
        compiler_params=pltpu.CompilerParams(
            dimension_semantics=("parallel", "arbitrary"),
            vmem_limit_bytes=32 * 1024 * 1024,
        ),
    )(x2, y2)

    total = jnp.sum(partials)          # 2 x 128 partial sums -> scalar
    return total / jnp.float32(n)


if __name__ == "__main__":
    key = jax.random.PRNGKey(0)
    kx, ky = jax.random.split(key)
    # NCHW, small shapes
    X = jax.random.normal(kx, (2, 4, 16, 16), dtype=jnp.float32)
    Y = jax.random.normal(ky, (2, 4, 16, 16), dtype=jnp.float32)

    loss = l1_charbonnier_loss(X, Y, eps=1e-6)
    jax.block_until_ready(loss)

    # Reference check in plain JAX (same math as the PyTorch module).
    ref = jnp.mean(jnp.sqrt((X - Y) ** 2 + 1e-6))
    assert jnp.allclose(loss, ref, rtol=1e-5, atol=1e-6), (loss, ref)

    print("KERNEL_OK")
</pallas_src>

<mosaic_0001>
module attributes {stable_mosaic.version = 11 : i64} {
  func.func @_charbonnier_kernel(%arg0: i32, %arg1: i32, %arg2: memref<16x128xf32, #tpu.memory_space<vmem>>, %arg3: memref<16x128xf32, #tpu.memory_space<vmem>>, %arg4: memref<1x1x128xf32, #tpu.memory_space<vmem>>, %arg5: memref<1x128xf32, #tpu.memory_space<vmem>>) attributes {dimension_semantics = [#tpu.dimension_semantics<parallel>, #tpu.dimension_semantics<arbitrary>], iteration_bounds = array<i64: 2, 1>, scalar_prefetch = 0 : i64, scratch_operands = 1 : i64, tpu.core_type = #tpu.core_type<tc>, window_params = [{transform_indices = @transform_0, window_bounds = array<i64: 16, 128>}, {transform_indices = @transform_1, window_bounds = array<i64: 16, 128>}, {transform_indices = @transform_2, window_bounds = array<i64: 1, 1, 128>}]} {
    %c0_i32 = arith.constant 0 : i32
    %0 = arith.cmpi eq, %arg1, %c0_i32 : i32
    %1 = arith.extui %0 : i1 to i32
    %c0_i32_0 = arith.constant 0 : i32
    %2 = arith.cmpi ne, %1, %c0_i32_0 : i32
    scf.if %2 {
      %cst_15 = arith.constant 0.000000e+00 : f32
      %35 = vector.broadcast %cst_15 : f32 to vector<1x128xf32>
      %c0_16 = arith.constant 0 : index
      %c0_17 = arith.constant 0 : index
      %36 = vector.load %arg5[%c0_16, %c0_17] : memref<1x128xf32, #tpu.memory_space<vmem>>, vector<1x128xf32>
      tpu.vector_store %arg5[%c0_16, %c0_17], %35 {strides = array<i32>} : memref<1x128xf32, #tpu.memory_space<vmem>>, vector<1x128xf32>,
    } else {
    }
    %c0 = arith.constant 0 : index
    %c0_1 = arith.constant 0 : index
    %3 = vector.load %arg2[%c0, %c0_1] : memref<16x128xf32, #tpu.memory_space<vmem>>, vector<16x128xf32>
    %c0_2 = arith.constant 0 : index
    %c0_3 = arith.constant 0 : index
    %4 = vector.load %arg3[%c0_2, %c0_3] : memref<16x128xf32, #tpu.memory_space<vmem>>, vector<16x128xf32>
    %5 = arith.subf %3, %4 : vector<16x128xf32>
    %6 = arith.mulf %5, %5 : vector<16x128xf32>
    %cst = arith.constant 9.99999997E-7 : f32
    %7 = vector.broadcast %cst : f32 to vector<16x128xf32>
    %8 = arith.addf %6, %7 : vector<16x128xf32>
    %9 = math.sqrt %8 : vector<16x128xf32>
    %c1_i32 = arith.constant 1 : i32
    %10 = arith.muli %arg0, %c1_i32 : i32
    %11 = arith.addi %10, %arg1 : i32
    %12 = tpu.iota {dimensions = array<i32: 0>} : vector<16x128xi32>
    %13 = tpu.iota {dimensions = array<i32: 1>} : vector<16x128xi32>
    %c16_i32 = arith.constant 16 : i32
    %14 = arith.muli %11, %c16_i32 : i32
    %15 = vector.broadcast %14 : i32 to vector<16x128xi32>
    %16 = arith.addi %15, %12 : vector<16x128xi32>
    %c16_i32_4 = arith.constant 16 : i32
    %17 = vector.broadcast %c16_i32_4 : i32 to vector<16x128xi32>
    %18 = arith.cmpi slt, %16, %17 : vector<16x128xi32>
    %c16_i32_5 = arith.constant 16 : i32
    %19 = vector.broadcast %c16_i32_5 : i32 to vector<16x128xi32>
    %20 = arith.cmpi eq, %16, %19 : vector<16x128xi32>
    %c0_i32_6 = arith.constant 0 : i32
    %21 = vector.broadcast %c0_i32_6 : i32 to vector<16x128xi32>
    %22 = arith.cmpi slt, %13, %21 : vector<16x128xi32>
    %23 = arith.andi %20, %22 : vector<16x128xi1>
    %24 = arith.ori %18, %23 : vector<16x128xi1>
    %cst_7 = arith.constant 0.000000e+00 : f32
    %25 = vector.broadcast %cst_7 : f32 to vector<16x128xf32>
    %26 = arith.select %24, %9, %25 : vector<16x128xi1>, vector<16x128xf32>
    %c0_8 = arith.constant 0 : index
    %c0_9 = arith.constant 0 : index
    %27 = vector.load %arg5[%c0_8, %c0_9] : memref<1x128xf32, #tpu.memory_space<vmem>>, vector<1x128xf32>
    %cst_10 = arith.constant dense<0.000000e+00> : vector<128xf32>
    %28 = vector.multi_reduction <add>, %26, %cst_10 [0] : vector<16x128xf32> to vector<128xf32>
    %29 = vector.shape_cast %28 : vector<128xf32> to vector<1x128xf32>
    %30 = arith.addf %27, %29 : vector<1x128xf32>
    %c0_11 = arith.constant 0 : index
    %c0_12 = arith.constant 0 : index
    %31 = vector.load %arg5[%c0_11, %c0_12] : memref<1x128xf32, #tpu.memory_space<vmem>>, vector<1x128xf32>
    tpu.vector_store %arg5[%c0_11, %c0_12], %30 {strides = array<i32>} : memref<1x128xf32, #tpu.memory_space<vmem>>, vector<1x128xf32>,
    %c0_i32_13 = arith.constant 0 : i32
    %32 = arith.cmpi eq, %arg1, %c0_i32_13 : i32
    %33 = arith.extui %32 : i1 to i32
    %c0_i32_14 = arith.constant 0 : i32
    %34 = arith.cmpi ne, %33, %c0_i32_14 : i32
    scf.if %34 {
      %c0_15 = arith.constant 0 : index
      %c0_16 = arith.constant 0 : index
      %35 = vector.load %arg5[%c0_15, %c0_16] : memref<1x128xf32, #tpu.memory_space<vmem>>, vector<1x128xf32>
      %36 = vector.shape_cast %35 : vector<1x128xf32> to vector<1x1x128xf32>
      %c0_17 = arith.constant 0 : index
      %c0_18 = arith.constant 0 : index
      %c0_19 = arith.constant 0 : index
      %37 = vector.load %arg4[%c0_17, %c0_18, %c0_19] : memref<1x1x128xf32, #tpu.memory_space<vmem>>, vector<1x1x128xf32>
      tpu.vector_store %arg4[%c0_17, %c0_18, %c0_19], %36 {strides = array<i32>} : memref<1x1x128xf32, #tpu.memory_space<vmem>>, vector<1x1x128xf32>,
    } else {
    }
    return
  }
  func.func @transform_0(%arg0: i32, %arg1: i32) -> (i32, i32) {
    %c1_i32 = arith.constant 1 : i32
    %0 = arith.muli %arg0, %c1_i32 : i32
    %1 = arith.addi %0, %arg1 : i32
    %c0_i32 = arith.constant 0 : i32
    %2 = arith.minsi %1, %c0_i32 : i32
    %c0_i32_0 = arith.constant 0 : i32
    %c0_i32_1 = arith.constant 0 : i32
    return %2, %c0_i32_0 : i32, i32
  }
  func.func @transform_1(%arg0: i32, %arg1: i32) -> (i32, i32) {
    %c1_i32 = arith.constant 1 : i32
    %0 = arith.muli %arg0, %c1_i32 : i32
    %1 = arith.addi %0, %arg1 : i32
    %c0_i32 = arith.constant 0 : i32
    %2 = arith.minsi %1, %c0_i32 : i32
    %c0_i32_0 = arith.constant 0 : i32
    %c0_i32_1 = arith.constant 0 : i32
    return %2, %c0_i32_0 : i32, i32
  }
  func.func @transform_2(%arg0: i32, %arg1: i32) -> (i32, i32, i32) {
    %c0_i32 = arith.constant 0 : i32
    %c0_i32_0 = arith.constant 0 : i32
    %c0_i32_1 = arith.constant 0 : i32
    return %arg0, %c0_i32, %c0_i32_0 : i32, i32, i32
  }
}

</mosaic_0001>

<bundles_post_ra>
// kernel: tpu_custom_call.1
= control target key start
LH: loop header
LB: loop body
LE: loop exit
PB: predicated region body
PF: predicated region fallthrough
CT: control target
= control target key end

     0   :  { %7 = vsyncpa [#allocation4], 0  ;;  %s902_s0 = inlined_call_operand.hbm [shape: f32[16,128], index: 0, kind: input, shape index: {}]   ;;  %s903_s1 = inlined_call_operand.hbm [shape: f32[16,128], index: 1, kind: input, shape index: {}]   ;;  %s904_s2 = inlined_call_operand.hbm [shape: f32[2,1,128], index: 2, kind: output, shape index: {}]  }
   0x1   :  { %9 = vsyncpa [#allocation4 + $0x1], 0 }
   0x2   :  { %10 = vsyncpa [#allocation7], 0 }
   0x3   :  { %12 = vsyncpa [#allocation7 + $0x1], 0 }
   0x4   :  { %13 = vsyncpa [#allocation5], 0 }
   0x5   :  { %15 = vsyncpa [#allocation5 + $0x1], 0  ;;  %s733_s9 = smov 0   ;;  %s735_s10 = smov 0  }
   0x6   :  { %s737_s11 = smov 0   ;;  %s739_s12 = smov 0  }
   0x7   :  { %s741_s13 = smov 0   ;;  %s743_s14 = smov 0  }
   0x8   :  { %s745_s15 = smov 0   ;;  %s747_s16 = smov 0  }
   0x9 LB: > { %s428_s17 = sadd.s32 4294967295, %s711_s16   ;;  %s429_s18 = sadd.s32 4294967294, %s711_s16   ;;  %s711_s16 = sphi %s747_s16, %s21_s16   ;;  %s707_s15 = sphi %s745_s15, %s916_s15   ;;  %s703_s14 = sphi %s743_s14, %s915_s14   ;;  %s699_s13 = sphi %s741_s13, %s892_s13   ;;  %s695_s12 = sphi %s739_s12, %s914_s12   ;;  %s691_s11 = sphi %s737_s11, %s913_s11   ;;  %s687_s10 = sphi %s735_s10, %s912_s10   ;;  %s683_s9 = sphi %s733_s9, %s911_s9  }
   0xa   : > { %s33_s19 = sadd.s32 1, %s707_s15  ;;  %p680_p1 = scmp.ne.s32.totalorder %s699_s13, 0 }
   0xb   : > { %p35_p0 = scmp.ge.s32.totalorder %s33_s19, 2  ;;  %p54_p2 = scmp.eq.s32.totalorder %s711_s16, 0 }
   0xc   : > { %p59_p3 = scmp.ne.s32.totalorder %s699_s13, %s695_s12  ;;  %p60_p5 = scmp.eq.s32.totalorder %s428_s17, 0 }
   0xd   : > { %s918_s19 = smov (%p35_p0, %s33_s19), 0  ;;  %p779_p4 = por %p680_p1, %p54_p2 }
   0xe   : > { %p783_p6 = por %p60_p5, %p59_p3  ;;  %s101_s22 = ssub.s32 %s707_s15, %s918_s19 }
   0xf   : > { %p102_p7 = scmp.eq.s32.totalorder %s101_s22, 0  ;;  %s104_s23 = sadd.s32 1, %s691_s11 }
  0x10   : > { %p114_p8 = scmp.ne.s32.totalorder %s691_s11, %s687_s10  ;;  %p115_p9 = scmp.eq.s32.totalorder %s428_s17, 1 }
  0x11   : > { %s791_s24 = scalar_select %p102_p7, %s691_s11, %s104_s23  }
  0x12   : > { %p120_p10 = scmp.ne.s32.totalorder %s687_s10, %s683_s9  ;;  %p121_p11 = scmp.eq.s32.totalorder %s429_s18, 1 }
  0x13   : > { %p797_p12 = por %p115_p9, %p114_p8  ;;  %p431_p13 = scmp.ge.s32.totalorder %s711_s16, 2 }
  0x14   : > { %p802_p0 = por %p121_p11, %p120_p10  ;;  %p463_p1 = scmp.lt.s32.totalorder %s711_s16, 2 }
  0x15   : > { %s154_s29 = sshll.u32 %s902_s0, 4  ;;  %s713_s30 = smov [#allocation3]   ;;  %s155_s29 = int_to_ptr.hbm [resolvable:$true] %s154_s29 }
  0x16   : > { %s156_s3 = sshll.u32 %s713_s30, 4  ;;  %p812_p2 = pnand %p463_p1, %p779_p4  ;;  %s157_s3 = int_to_ptr.vmem [resolvable:$true] %s156_s3 }
  0x17   : > { %p438_p3 = scmp.ge.s32.totalorder %s711_s16, 1  ;;  %p189_p5 = scmp.lt.s32.totalorder %s711_s16, 3 }
  0x18   : > { %s544_s5 = sshra.s32 %s155_s29, 4  ;;  %p548_p8 = pneg %p812_p2  ;;  %s545_s5 = int_to_ptr.hbm [resolvable:$true] %s544_s5 }
  0x19   : > { %s546_s6 = scalar_lea.hbm %s545_s5, 16  ;;  %s551_s12 = scalar_lea.hbm %s902_s0, 16 }
  0x1a   : > { %p547_p7 = scmp.ne.s32.totalorder %s545_s5, %s546_s6  ;;  %p553_p4 = scmp.lt.s32.totalorder %s551_s12, %s546_s6 }
  0x1c   : > { %p549_p9 = pnand %p548_p8, %p547_p7 }
  0x1e   : > { %p550_p10 = pneg %p549_p9 }
  0x20   : > { %p555_p11 = pnand %p553_p4, %p550_p10 }
  0x22   : > { %558 = shalt.err (!%p555_p11)
}
  0x23   : > { %s714_s17 = smov 128   ;;  %s715_s18 = smov 8  }
  0x24   : > { %455 = dma.hbm_to_vmem [thread:$0]  (!%p812_p2), %s155_s29, 256, %s157_s3, [#allocation4], %s714_s17, %s714_s17, %s715_s18  }
  0x25   : > { %p832_p1 = pnand %p438_p3, %p189_p5  ;;  %s179_s27 = sshll.u32 %s903_s1, 4  ;;  %s180_s27 = int_to_ptr.hbm [resolvable:$true] %s179_s27 }
  0x26   : > { %s716_s28 = smov [#allocation6]   ;;  %s574_s5 = sshra.s32 %s180_s27, 4  ;;  %s575_s5 = int_to_ptr.hbm [resolvable:$true] %s574_s5 }
  0x27   : > { %s181_s30 = sshll.u32 %s716_s28, 4  ;;  %s576_s6 = scalar_lea.hbm %s575_s5, 16  ;;  %s182_s30 = int_to_ptr.vmem [resolvable:$true] %s181_s30 }
  0x28   : > { %p577_p7 = scmp.ne.s32.totalorder %s575_s5, %s576_s6  ;;  %s581_s7 = scalar_lea.hbm %s903_s1, 16 }
  0x29   : > { %p583_p3 = scmp.lt.s32.totalorder %s581_s7, %s576_s6 }
  0x2a   : > { %p579_p9 = pnand %p577_p7, %p548_p8 }
  0x2c   : > { %p580_p10 = pneg %p579_p9 }
  0x2e   : > { %p585_p5 = pnand %p583_p3, %p580_p10 }
  0x30   : > { %588 = shalt.err (!%p585_p5)
}
  0x31   : > { %458 = dma.hbm_to_vmem [thread:$0]  (!%p812_p2), %s180_s27, 256, %s182_s30, [#allocation7], %s714_s17, %s714_s17, %s715_s18  }
  0x32   : > { %193 = sbr.rel (%p832_p1) target bundleno = 116 (0x74), region = 28  ;;  %s195_s8 = sand.u32 (!%p832_p1), 1, %s699_s13  }
  0x33   : > { %s439_s12 = sshll.u32 (!%p832_p1), %s195_s8, 4  ;;  %s196_s22 = scalar_lea.sflag (!%p832_p1), [#allocation4], %s195_s8 }
  0x34   : > { %s199_s23 = scalar_lea.vmem (!%p832_p1), [#allocation3], %s439_s12 }
  0x37   : > { %669 = dma.done.wait (%p783_p6), %s196_s22, 256  }
  0x38   : > { %671 = vsyncadd (%p783_p6), %s196_s22, 4294967040  ;;  %s206_s28 = scalar_lea.sflag [#allocation7], %s195_s8  ;;  %s209_s5 = scalar_lea.vmem [#allocation6], %s439_s12 }
  0x39   : > { %673 = dma.done.wait (%p783_p6), %s206_s28, 256  }
  0x3a   : > { %675 = vsyncadd (%p783_p6), %s206_s28, 4294967040  ;;  %v717_v0 = vmov 0.0   ;;  %v248_v1 = vld [vmem:[%s199_s23] sm:$0xff]  ;;  %v249_v2 = vld [vmem:[%s199_s23 + $0x8] sm:$0xff]  ;;  %v283_v11 = vlaneseq  ;;  %s441_s21 = sshll.u32 %s703_s14, 4  ;;  %s233_s4 = sand.u32 1, %s687_s10  }
  0x3b   : > { %247 = vst [vmem:[#allocation2] sm:$0x1] %v717_v0  ;;  %v250_v3 = vld [vmem:[%s209_s5] sm:$0xff]  ;;  %v251_v4 = vld [vmem:[%s209_s5 + $0x8] sm:$0xff]  ;;  %v289_v21 = vstv %s441_s21  ;;  %s327_s20 = scalar_lea.hbm %s904_s2, %s703_s14  ;;  %s234_s27 = scalar_lea.vmem [#allocation8], %s233_s4 }
  0x3c   : > { %v252_v5 = vsub.f32 %v248_v1, %v250_v3  ;;  %v253_v6 = vsub.f32 %v249_v2, %v251_v4  ;;  %v284_v15 = vshrl.u32 %v283_v11, 7  ;;  %s329_s30 = sshll.u32 %s234_s27, 4  ;;  %s331_s6 = sshll.u32 %s327_s20, 4  ;;  %s330_s30 = int_to_ptr.vmem [resolvable:$true] %s329_s30  ;;  %s332_s6 = int_to_ptr.hbm [resolvable:$true] %s331_s6 }
  0x3d   : > { %s319_s29 = scalar_lea.sflag [#allocation5], %s233_s4  ;;  %s618_s3 = sshra.s32 %s332_s6, 4  ;;  %s619_s3 = int_to_ptr.hbm [resolvable:$true] %s618_s3 }
  0x3e   : > { %v254_v7 = vmul.f32 %v252_v5, %v252_v5  ;;  %v255_v8 = vmul.f32 %v253_v6, %v253_v6  ;;  %v285_v20 = vadd.s32 8, %v284_v15  ;;  %v290_v25 = vadd.s32 %v289_v21, %v284_v15  ;;  %s620_s7 = scalar_lea.hbm %s619_s3, 1  ;;  %s624_s22 = scalar_lea.hbm %s904_s2, 2 }
  0x3f   : > { %p621_p6 = scmp.ne.s32.totalorder %s619_s3, %s620_s7  ;;  %p625_p4 = scmp.lt.s32.totalorder %s619_s3, %s904_s2 }
  0x40   : > { %v256_v9 = vadd.f32 1e-06, %v254_v7  ;;  %v257_v10 = vadd.f32 1e-06, %v255_v8  ;;  %v291_v27 = vadd.s32 %v289_v21, %v285_v20  ;;  %vm292_vm4 = vcmp.lt.s32.totalorder %v290_v25, 16  ;;  %p626_p11 = scmp.lt.s32.totalorder %s624_s22, %s620_s7 }
  0x41   : > { %p622_p2 = pnand %p621_p6, %p797_p12 }
  0x42   : > { %540 = vrsqrt.f32 %v256_v9  ;;  %vm265_vm0 = vcmp.eq.f32.partialorder %v256_v9, inf  ;;  %v268_v28 = vand.u32 2147483648, %v256_v9  ;;  %vm267_vm1 = vcmp.eq.f32.partialorder %v256_v9, 0.0  ;;  %v303_v45 = vld [vmem:[#allocation2] sm:$0x1]  ;;  %p627_p1 = por %p626_p11, %p625_p4 }
  0x43   : > { %542 = vrsqrt.f32 %v257_v10  ;;  %vm277_vm2 = vcmp.eq.f32.partialorder %v257_v10, inf  ;;  %v280_v31 = vand.u32 2147483648, %v257_v10  ;;  %vm279_vm3 = vcmp.eq.f32.partialorder %v257_v10, 0.0  ;;  %p623_p8 = pneg %p622_p2 }
  0x44   : > { %vm293_vm5 = vcmp.lt.s32.totalorder %v291_v27, 16 }
  0x45   : > { %p628_p7 = pnand %p627_p1, %p623_p8 }
  0x48   : > { %v541_v12 = vpop.eup %540 }
  0x49   : > { %v543_v13 = vpop.eup %542  ;;  %v259_v14 = vmul.f32 %v541_v12, %v256_v9 }
  0x4a   : > { %v271_v16 = vmul.f32 %v543_v13, %v257_v10 }
  0x4b   : > { %v260_v17 = vmul.f32 %v541_v12, %v259_v14 }
  0x4c   : > { %v272_v18 = vmul.f32 %v543_v13, %v271_v16 }
  0x4d   : > { %v261_v19 = vmul.f32 0.5, %v260_v17 }
  0x4e   : > { %v273_v22 = vmul.f32 0.5, %v272_v18 }
  0x4f   : > { %v262_v23 = vsub.f32 1.5, %v261_v19 }
  0x50   : > { %v274_v24 = vsub.f32 1.5, %v273_v22 }
  0x51   : > { %v263_v26 = vmul.f32 %v541_v12, %v262_v23 }
  0x52   : > { %v275_v29 = vmul.f32 %v543_v13, %v274_v24 }
  0x53   : > { %v264_v30 = vmul.f32 %v263_v26, %v256_v9 }
  0x54   : > { %v276_v32 = vmul.f32 %v275_v29, %v257_v10 }
  0x55   : > { %v266_v33 = vsel %vm265_vm0, %v256_v9, %v264_v30 }
  0x56   : > { %v269_v34 = vsel %vm267_vm1, %v268_v28, %v266_v33  ;;  %v278_v35 = vsel %vm277_vm2, %v257_v10, %v276_v32 }
  0x57   : > { %v281_v36 = vsel %vm279_vm3, %v280_v31, %v278_v35  ;;  %v301_v37 = vsel %vm292_vm4, %v269_v34, 0.0 }
  0x58   : > { %v302_v38 = vsel %vm293_vm5, %v281_v36, 0.0 }
  0x59   : > { %v304_v39 = vadd.f32 %v302_v38, %v301_v37 }
  0x5b   : > { %v305_v40 = vrot.slane %v304_v39, 4 }
  0x5d   : > { %v306_v41 = vadd.f32 %v305_v40, %v304_v39 }
  0x5f   : > { %v307_v42 = vrot.slane %v306_v41, 2 }
  0x61   : > { %v308_v43 = vadd.f32 %v307_v42, %v306_v41 }
  0x63   : > { %v309_v44 = vrot.slane %v308_v43, 1 }
  0x65   : > { %v310_v46 = vadd.f32 %v309_v44, %v308_v43 }
  0x67   : > { %v311_v47 = vadd.f32 %v310_v46, %v303_v45 }
  0x69   : > { %312 = vst [vmem:[#allocation2] sm:$0x1] %v311_v47 }
  0x70   : > { %v316_v48 = vld [vmem:[#allocation2] sm:$0x1] }
  0x71   : > { %317 = vst [vmem:[%s234_s27] sm:$0x1] %v316_v48 }
  0x72   : > { %631 = shalt.err (!%p628_p7)
}
  0x73   : > { %450 = dma.vmem_to_hbm [thread:$0]  (%p797_p12), %s330_s30, 16, %s332_s6, %s319_s29  }
  0x74 PF: > { %s343_s28 = sand.u32 1, %s683_s9   ;;  %p460_p9 = pnand %p431_p13, %p802_p0 }
  0x75   : > { %s344_s5 = scalar_lea.sflag [#allocation5], %s343_s28 }
  0x76   : > { %p461_p10 = pneg %p460_p9 }
  0x78   : > { %677 = dma.done.wait (%p461_p10), %s344_s5, 16  }
  0x79   : > { %679 = vsyncadd (%p461_p10), %s344_s5, 4294967280  ;;  %s21_s16 = sadd.s32 1, %s711_s16   ;;  %s911_s9 = smov %s687_s10 }
  0x7a   : > { %p18_p3 = scmp.ge.s32.totalorder %s21_s16, 4   ;;  %s912_s10 = smov %s691_s11 }
  0x7b   : > { %s913_s11 = smov %s791_s24  ;;  %s914_s12 = smov %s699_s13 }
  0x7c   : > { %s892_s13 = smov 0   ;;  %s915_s14 = smov %s707_s15 }
  0x7d   : > { %s916_s15 = smov %s918_s19  ;;  %20 = sbr.rel (!%p18_p3) target bundleno = 9 (0x9), region = 94 }
  0x82   :  { %349 = vsyncpa [#allocation4], 1 }
  0x83   :  { %351 = vsyncpa [#allocation4 + $0x1], 1 }
  0x84   :  { %352 = vsyncpa [#allocation7], 1 }
  0x85   :  { %354 = vsyncpa [#allocation7 + $0x1], 1 }
  0x86   :  { %355 = vsyncpa [#allocation5], 1 }
  0x87   :  { %357 = vsyncpa [#allocation5 + $0x1], 1 }

</bundles_post_ra>
